<compile_context>
chip_gen: v7x
topology: tpu7x:2x2x1
jax: 0.10.0
libtpu: 0.0.40
codegen_flags: <defaults>
</compile_context>

<pallas_src>
import math

import jax
import jax.numpy as jnp
from jax.experimental import pallas as pl
from jax.experimental.pallas import tpu as pltpu

_SUBLANE = 8
_MAX_ONEHOT_VOCAB = 2048   # above this the one-hot MXU gather is never worth it
_DMA_SLOTS = 8             # outstanding row DMAs in the gather fallback


def _round_up(x: int, m: int) -> int:
    return (x + m - 1) // m * m


def _vmem_capacity_bytes() -> int:
    """Physical VMEM per TensorCore (64 MiB v7x, 128 MiB v5e/v6e); safe default."""
    try:
        cap = int(pltpu.get_tpu_info().vmem_capacity_bytes)
        if cap >= 32 * 1024 * 1024:
            return cap
    except Exception:
        pass
    return 64 * 1024 * 1024


def _vmem_limit(needed: int, capacity: int) -> int:
    cap = capacity - 8 * 1024 * 1024          # headroom for Mosaic scratch / sems
    want = max(int(needed * 5 // 4) + (1 << 20), 32 * 1024 * 1024)
    return int(min(want, cap))


def _tokens_per_block(n_tok: int, d_model: int, itemsize: int, max_t: int) -> int:
    # Cap T so a single (T, d_model) buffer stays <= 8 MiB (adaptive to d_model).
    cap = max(_SUBLANE, (8 * 1024 * 1024) // max(1, d_model * itemsize))
    cap = max(_SUBLANE, cap // _SUBLANE * _SUBLANE)
    t = min(max_t, _round_up(n_tok, _SUBLANE), cap)
    return max(_SUBLANE, t // _SUBLANE * _SUBLANE)


def _pick_vocab_chunk(vocab: int) -> int:
    for c in (512, 256, 128):
        if vocab % c == 0 and vocab > c:
            return c
    return vocab


# ---------------------------------------------------------------------------
# Fast path: whole table resident in VMEM, chunked one-hot MXU gather.
# ---------------------------------------------------------------------------
def _make_resident_kernel(scale: float, vocab: int, kv_chunk: int, exact_f32: bool):
    n_chunks = vocab // kv_chunk

    def kernel(ids_ref, table_ref, out_ref):
        ids = ids_ref[...]                                   # (T, 1) int32
        tokens, d_model = out_ref.shape
        # f32 tables: fold sqrt(d_model) into the exact selection matrix and use
        # HIGHEST (multi-pass) precision so the gathered rows stay ~exact.
        # Narrower tables (bf16): single MXU pass, scale the f32 accumulator.
        sel_val = scale if exact_f32 else 1.0
        prec = jax.lax.Precision.HIGHEST if exact_f32 else jax.lax.Precision.DEFAULT
        acc = jnp.zeros((tokens, d_model), jnp.float32)
        for c in range(n_chunks):                            # static, <= 16 iters
            k0 = c * kv_chunk
            iota = k0 + jax.lax.broadcasted_iota(jnp.int32, (tokens, kv_chunk), 1)
            sel = jnp.where(ids == iota, sel_val, 0.0).astype(table_ref.dtype)
            acc = acc + jnp.dot(
                sel,
                table_ref[pl.ds(k0, kv_chunk), :],
                preferred_element_type=jnp.float32,
                precision=prec,
            )
        if not exact_f32:
            acc = acc * scale
        out_ref[...] = acc.astype(out_ref.dtype)

    return kernel


def _embed_resident(flat_ids: jax.Array, table: jax.Array, n_tok: int) -> jax.Array:
    vocab, d_model = table.shape
    itemsize = table.dtype.itemsize
    scale = math.sqrt(d_model)
    capacity = _vmem_capacity_bytes()

    T = _tokens_per_block(n_tok, d_model, itemsize, max_t=512)
    n_pad = _round_up(n_tok, T)

    ids = jnp.clip(flat_ids, 0, vocab - 1).astype(jnp.int32)
    if n_pad != n_tok:
        ids = jnp.pad(ids, (0, n_pad - n_tok))
    ids2d = ids.reshape(n_pad, 1)

    kv_chunk = _pick_vocab_chunk(vocab)
    exact_f32 = table.dtype == jnp.float32

    needed = (
        vocab * d_model * itemsize        # whole table, single VMEM copy
        + 2 * T * d_model * itemsize      # double-buffered output tiles
        + 2 * T * 128 * 4                 # lane-padded id tiles
        + T * kv_chunk * 4                # one selection chunk
        + T * d_model * 4                 # f32 accumulator
        + (2 << 20)
    )

    grid_spec = pltpu.PrefetchScalarGridSpec(
        num_scalar_prefetch=0,
        grid=(n_pad // T,),
        in_specs=[
            pl.BlockSpec((T, 1), lambda b: (b, 0)),              # token-id tile
            pl.BlockSpec(memory_space=pltpu.MemorySpace.VMEM),   # whole table, 1 buffer
        ],
        out_specs=pl.BlockSpec((T, d_model), lambda b: (b, 0)),
    )

    out_flat = pl.pallas_call(
        _make_resident_kernel(scale, vocab, kv_chunk, exact_f32),
        out_shape=jax.ShapeDtypeStruct((n_pad, d_model), table.dtype),
        grid_spec=grid_spec,
        compiler_params=pltpu.CompilerParams(
            dimension_semantics=("parallel",),
            vmem_limit_bytes=_vmem_limit(needed, capacity),
        ),
    )(ids2d, table)

    return out_flat[:n_tok]


# ---------------------------------------------------------------------------
# General path: batched manual-DMA row gather from an HBM-resident table.
# ---------------------------------------------------------------------------
def _make_dma_gather_kernel(scale: float, tokens_per_block: int, n_slots: int):
    T = tokens_per_block

    def kernel(ids_ref, table_hbm, out_ref, rows_vmem, sems):
        base = pl.program_id(0) * T

        def issue(t):
            tok = ids_ref[base + t]                      # scalar id from SMEM
            pltpu.make_async_copy(
                table_hbm.at[pl.ds(tok, 1)],             # one HBM row
                rows_vmem.at[pl.ds(t, 1)],               # its slot in the tile
                sems.at[t % n_slots],
            ).start()

        def wait(t):
            # Wait descriptor only needs the matching semaphore / transfer size.
            pltpu.make_async_copy(
                table_hbm.at[pl.ds(0, 1)],
                rows_vmem.at[pl.ds(0, 1)],
                sems.at[t % n_slots],
            ).wait()

        n_prime = min(n_slots, T)

        @pl.loop(0, n_prime)                             # prime up to n_slots DMAs
        def _(t):
            issue(t)

        if T > n_slots:
            @pl.loop(n_slots, T)                         # steady state: wait one, issue one
            def _(t):
                wait(t - n_slots)
                issue(t)

        @pl.loop(T - n_prime, T)                         # drain remaining in-flight copies
        def _(t):
            wait(t)

        # One dense, lane/sublane-aligned scaled store for the whole token tile.
        out_ref[...] = (rows_vmem[...] * scale).astype(out_ref.dtype)

    return kernel


def _embed_dma_gather(flat_ids: jax.Array, table: jax.Array, n_tok: int) -> jax.Array:
    vocab, d_model = table.shape
    itemsize = table.dtype.itemsize
    scale = math.sqrt(d_model)
    capacity = _vmem_capacity_bytes()

    T = _tokens_per_block(n_tok, d_model, itemsize, max_t=256)
    n_pad = _round_up(n_tok, T)

    ids = jnp.clip(flat_ids, 0, vocab - 1).astype(jnp.int32)
    if n_pad != n_tok:
        ids = jnp.pad(ids, (0, n_pad - n_tok))
    # TODO(synk): for very large token counts (>~100K), split into multiple
    # pallas_calls so the scalar-prefetched id vector stays comfortably in SMEM.

    needed = 3 * T * d_model * itemsize + (2 << 20)      # rows scratch + 2 out buffers

    grid_spec = pltpu.PrefetchScalarGridSpec(
        num_scalar_prefetch=1,                           # ids -> SMEM
        grid=(n_pad // T,),
        in_specs=[pl.BlockSpec(memory_space=pl.ANY)],    # table stays in HBM
        out_specs=pl.BlockSpec((T, d_model), lambda b, ids_sref: (b, 0)),
        scratch_shapes=[
            pltpu.VMEM((T, d_model), table.dtype),       # gathered rows
            pltpu.SemaphoreType.DMA((_DMA_SLOTS,)),      # in-flight DMA ring
        ],
    )

    out_flat = pl.pallas_call(
        _make_dma_gather_kernel(scale, T, _DMA_SLOTS),
        out_shape=jax.ShapeDtypeStruct((n_pad, d_model), table.dtype),
        grid_spec=grid_spec,
        compiler_params=pltpu.CompilerParams(
            dimension_semantics=("parallel",),
            vmem_limit_bytes=_vmem_limit(needed, capacity),
        ),
    )(ids, table)

    return out_flat[:n_tok]


# ---------------------------------------------------------------------------
# Public wrapper == InputEmbeddings.forward
# ---------------------------------------------------------------------------
def input_embeddings(x_ids: jax.Array, table: jax.Array) -> jax.Array:
    """x_ids: (B, S) int token ids; table: (vocab, d_model). Returns (B, S, d_model)."""
    B, S = x_ids.shape
    vocab, d_model = table.shape
    n_tok = B * S
    flat_ids = x_ids.reshape(n_tok)

    capacity = _vmem_capacity_bytes()
    table_bytes = vocab * d_model * table.dtype.itemsize
    # Resident one-hot path only for small vocabs whose table fits comfortably
    # (<= 1/4 of physical VMEM: 16 MiB on v7x, 32 MiB on v5e/v6e). Everything
    # else (realistic 32K-256K vocabs) uses the batched DMA row gather.
    if vocab <= _MAX_ONEHOT_VOCAB and table_bytes <= capacity // 4:
        out_flat = _embed_resident(flat_ids, table, n_tok)
    else:
        out_flat = _embed_dma_gather(flat_ids, table, n_tok)

    return out_flat.reshape(B, S, d_model)


if __name__ == "__main__":
    d_model = 128
    B, S = 2, 8

    key = jax.random.PRNGKey(0)
    k1, k2, k3, k4 = jax.random.split(key, 4)

    # --- resident (VMEM table + one-hot MXU) path: small vocab ---
    vocab_small = 64
    table_s = jax.random.normal(k1, (vocab_small, d_model), dtype=jnp.float32)
    ids_s = jax.random.randint(k2, (B, S), 0, vocab_small, dtype=jnp.int32)
    out_s = jax.block_until_ready(input_embeddings(ids_s, table_s))
    ref_s = table_s[ids_s] * math.sqrt(d_model)
    assert out_s.shape == (B, S, d_model)
    assert out_s.dtype == jnp.float32
    assert jnp.allclose(out_s, ref_s, atol=1e-4, rtol=1e-4)

    # --- batched DMA row-gather path: vocab above the one-hot crossover ---
    vocab_big = 4096
    table_b = jax.random.normal(k3, (vocab_big, d_model), dtype=jnp.float32)
    ids_b = jax.random.randint(k4, (B, S), 0, vocab_big, dtype=jnp.int32)
    out_b = jax.block_until_ready(input_embeddings(ids_b, table_b))
    ref_b = table_b[ids_b] * math.sqrt(d_model)
    assert out_b.shape == (B, S, d_model)
    assert jnp.allclose(out_b, ref_b, atol=1e-4, rtol=1e-4)

    print("KERNEL_OK")
</pallas_src>

<mosaic_0001>
module attributes {stable_mosaic.version = 11 : i64} {
  func.func @kernel(%arg0: i32, %arg1: memref<16x1xi32, #tpu.memory_space<vmem>>, %arg2: memref<64x128xf32, #tpu.memory_space<vmem>>, %arg3: memref<16x128xf32, #tpu.memory_space<vmem>>) attributes {dimension_semantics = [#tpu.dimension_semantics<parallel>], iteration_bounds = array<i64: 1>, scalar_prefetch = 0 : i64, scratch_operands = 0 : i64, tpu.core_type = #tpu.core_type<tc>, window_params = [{transform_indices = @transform_0, window_bounds = array<i64: 16, 1>}, {pipeline_mode = #tpu.pipeline_mode<synchronous>, transform_indices = @transform_1, window_bounds = array<i64: 64, 128>}, {transform_indices = @transform_2, window_bounds = array<i64: 16, 128>}]} {
    %c0 = arith.constant 0 : index
    %c0_0 = arith.constant 0 : index
    %0 = vector.load %arg1[%c0, %c0_0] : memref<16x1xi32, #tpu.memory_space<vmem>>, vector<16x1xi32>
    %cst = arith.constant 0.000000e+00 : f32
    %1 = vector.broadcast %cst : f32 to vector<16x128xf32>
    %2 = tpu.iota {dimensions = array<i32: 1>} : vector<16x64xi32>
    %c0_i32 = arith.constant 0 : i32
    %3 = vector.broadcast %c0_i32 : i32 to vector<16x64xi32>
    %4 = arith.addi %3, %2 : vector<16x64xi32>
    %5 = vector.broadcast %0 : vector<16x1xi32> to vector<16x64xi32>
    %6 = arith.cmpi eq, %5, %4 : vector<16x64xi32>
    %cst_1 = arith.constant 11.3137083 : f32
    %cst_2 = arith.constant 0.000000e+00 : f32
    %7 = vector.broadcast %cst_1 : f32 to vector<16x64xf32>
    %8 = vector.broadcast %cst_2 : f32 to vector<16x64xf32>
    %9 = arith.select %6, %7, %8 : vector<16x64xi1>, vector<16x64xf32>
    %c0_3 = arith.constant 0 : index
    %c0_4 = arith.constant 0 : index
    %10 = vector.load %arg2[%c0_3, %c0_4] : memref<64x128xf32, #tpu.memory_space<vmem>>, vector<64x128xf32>
    %cst_5 = arith.constant dense<0.000000e+00> : vector<16x128xf32>
    %11 = tpu.matmul %9, %10, %cst_5 {dimension_numbers = #tpu.dot_dimension_numbers<[1], [0], [0], [1], [0, 0, 1, 1], [], []>, precision = #tpu.contract_precision<fp32>} : vector<16x64xf32>, vector<64x128xf32>, vector<16x128xf32> -> vector<16x128xf32>
    %12 = arith.addf %1, %11 : vector<16x128xf32>
    %c0_6 = arith.constant 0 : index
    %c0_7 = arith.constant 0 : index
    %13 = vector.load %arg3[%c0_6, %c0_7] : memref<16x128xf32, #tpu.memory_space<vmem>>, vector<16x128xf32>
    tpu.vector_store %arg3[%c0_6, %c0_7], %12 {strides = array<i32>} : memref<16x128xf32, #tpu.memory_space<vmem>>, vector<16x128xf32>,
    return
  }
  func.func @transform_0(%arg0: i32) -> (i32, i32) {
    %c0_i32 = arith.constant 0 : i32
    %c0_i32_0 = arith.constant 0 : i32
    return %arg0, %c0_i32 : i32, i32
  }
  func.func @transform_1(%arg0: i32) -> (i32, i32) {
    %c0_i32 = arith.constant 0 : i32
    %c0_i32_0 = arith.constant 0 : i32
    %c0_i32_1 = arith.constant 0 : i32
    return %c0_i32, %c0_i32_0 : i32, i32
  }
  func.func @transform_2(%arg0: i32) -> (i32, i32) {
    %c0_i32 = arith.constant 0 : i32
    %c0_i32_0 = arith.constant 0 : i32
    return %arg0, %c0_i32 : i32, i32
  }
}

</mosaic_0001>

<bundles_post_ra>
// kernel: tpu_custom_call.1
= control target key start
LH: loop header
LB: loop body
LE: loop exit
PB: predicated region body
PF: predicated region fallthrough
CT: control target
= control target key end

     0   :  { %7 = vsyncpa [#allocation3], 0  ;;  %s1086_s0 = inlined_call_operand.vmem [shape: s32[16,1], index: 0, kind: input, shape index: {}]   ;;  %s1087_s1 = inlined_call_operand.hbm [shape: f32[64,128], index: 1, kind: input, shape index: {}]   ;;  %s1088_s2 = inlined_call_operand.hbm [shape: f32[16,128], index: 2, kind: output, shape index: {}]  }
   0x1   :  { %8 = vsyncpa [#allocation4], 0  ;;  %s989_s9 = smov [#allocation2]   ;;  %s941_s13 = scalar_lea.hbm %s1087_s1, 1024 }
   0x2   :  { %s16_s10 = sshll.u32 %s989_s9, 4  ;;  %p942_p0 = scmp.ne.s32.totalorder %s1087_s1, %s941_s13  ;;  %s17_s10 = int_to_ptr.vmem [resolvable:$true] %s16_s10 }
   0x3   :  { %p945_p1 = scmp.lt.u32.totalorder %s941_s13, %s1087_s1 }
   0x5   :  { %p947_p2 = pnand %p945_p1, %p942_p0 }
   0x7   :  { %950 = shalt.err (!%p947_p2)
}
   0x8   :  { %s951_s18 = scalar_lea.vmem %s17_s10, 1024  ;;  %p956_p4 = scmp.lt.s32.totalorder %s17_s10, %s17_s10 }
   0x9   :  { %p952_p3 = scmp.ne.s32.totalorder %s17_s10, %s951_s18  ;;  %p957_p5 = scmp.lt.s32.totalorder %s951_s18, %s951_s18 }
   0xb   :  { %p958_p6 = por %p957_p5, %p956_p4 }
   0xd   :  { %p959_p7 = pnand %p958_p6, %p952_p3 }
   0xf   :  { %962 = shalt.err (!%p959_p7)
}
  0x10   :  { %s990_s19 = smov 128   ;;  %s991_s20 = smov 8  }
  0x11   :  { %22 = dma.hbm_to_vmem [thread:$0]  %s1087_s1, 1024, %s17_s10, [#allocation3], %s990_s19, %s990_s19, %s991_s20  }
  0x12   :  { %985 = dma.done.wait [#allocation3], 1024  }
  0x13   :  { %986 = vsyncadd [#allocation3], 4294966272  ;;  %v992_v0 = vmov 0   ;;  %v26_v1 = vld [vmem:[%s1086_s0] sm:$0xff]  ;;  %v41_v3 = vld [vmem:[#allocation2 + $0x8] sm:$0xff]  ;;  %vm48_vm0 = vcmask 523264  }
  0x14   :  { %940 = vset.pattern.permute.xlu0 %v992_v0  ;;  %v40_v2 = vld [vmem:[#allocation2] sm:$0xff]  ;;  %v42_v5 = vld [vmem:[#allocation2 + $0x10] sm:$0xff]  ;;  %v43_v6 = vld [vmem:[#allocation2 + $0x18] sm:$0xff]  ;;  %v59_v8 = vand.u32 4294901760, %v41_v3 }
  0x15   :  { %31 = vperm.xlu0 %940, %v26_v1   ;;  %v56_v4 = vand.u32 4294901760, %v40_v2  ;;  %v27_v7 = vld [vmem:[%s1086_s0 + $0x8] sm:$0xff]  ;;  %v62_v9 = vand.u32 4294901760, %v42_v5  ;;  %v65_v10 = vand.u32 4294901760, %v43_v6  ;;  %v44_v11 = vld [vmem:[#allocation2 + $0x20] sm:$0xff]  ;;  %v46_v17 = vld [vmem:[#allocation2 + $0x30] sm:$0xff] }
  0x16   :  { %v45_v12 = vld [vmem:[#allocation2 + $0x28] sm:$0xff]  ;;  %v68_v15 = vand.u32 4294901760, %v44_v11  ;;  %v47_v18 = vld [vmem:[#allocation2 + $0x38] sm:$0xff]  ;;  %v74_v19 = vand.u32 4294901760, %v46_v17  ;;  %v157_v22 = vsub.f32 %v41_v3, %v59_v8  ;;  %v28_v3 = vlaneseq  ;;  %s994_s0 = smov [#allocation5]  }
  0x17   :  { %v1031_v13 = vpack.c.bf16 %v59_v8, %v56_v4  ;;  %v1033_v14 = vpack.c.bf16 %v65_v10, %v62_v9  ;;  %v71_v16 = vand.u32 4294901760, %v45_v12  ;;  %v77_v20 = vand.u32 4294901760, %v47_v18  ;;  %s642_s1 = sshll.u32 %s994_s0, 4  ;;  %s643_s1 = int_to_ptr.vmem [resolvable:$true] %s642_s1 }
  0x18   :  { %v150_v21 = vsub.f32 %v40_v2, %v56_v4  ;;  %v158_v25 = vand.u32 4294901760, %v157_v22  ;;  %v164_v29 = vsub.f32 %v42_v5, %v62_v9  ;;  %v171_v30 = vsub.f32 %v43_v6, %v65_v10  ;;  %s963_s27 = scalar_lea.vmem %s643_s1, 256  ;;  %p968_p9 = scmp.lt.s32.totalorder %s643_s1, %s643_s1 }
  0x19   :  { %34 = vperm.xlu0 %940, %v27_v7   ;;  %877 = vmatprep.subr.bf16.mxu0 %v1031_v13  ;;  %v1041_v23 = vpack.c.bf16 %v71_v16, %v68_v15  ;;  %v1045_v26 = vpack.c.bf16 %v77_v20, %v74_v19  ;;  %v178_v38 = vsub.f32 %v44_v11, %v68_v15  ;;  %v29_v4 = vand.u32 127, %v28_v3  ;;  %p964_p8 = scmp.ne.s32.totalorder %s643_s1, %s963_s27  ;;  %p969_p10 = scmp.lt.s32.totalorder %s963_s27, %s963_s27 }
  0x1a   :  { %829 = vmatprep.subr.bf16.mxu1 %v1031_v13  ;;  %879 = vmatpush3.bf16.msra.mxu0 %v1031_v13  ;;  %v151_v24 = vand.u32 4294901760, %v150_v21  ;;  %v159_v28 = vsub.f32 %v157_v22, %v158_v25  ;;  %v165_v33 = vand.u32 4294901760, %v164_v29  ;;  %v172_v35 = vand.u32 4294901760, %v171_v30 }
  0x1b   :  { %831 = vmatpush3.bf16.msra.mxu1 %v1031_v13  ;;  %881 = vmatprep.subr.bf16.mxu0 %v1033_v14  ;;  %v185_v41 = vsub.f32 %v45_v12, %v71_v16  ;;  %v179_v43 = vand.u32 4294901760, %v178_v38  ;;  %v192_v47 = vsub.f32 %v46_v17, %v74_v19  ;;  %v199_v48 = vsub.f32 %v47_v18, %v77_v20  ;;  %p970_p11 = por %p969_p10, %p968_p9 }
  0x1c   :  { %833 = vmatprep.subr.bf16.mxu1 %v1033_v14  ;;  %v152_v27 = vsub.f32 %v150_v21, %v151_v24  ;;  %v160_v32 = vand.u32 4294901760, %v159_v28  ;;  %v1051_v34 = vpack.c.bf16 %v158_v25, %v151_v24  ;;  %v166_v37 = vsub.f32 %v164_v29, %v165_v33 }
  0x1d   :  { %v896_v39 = vpack.c.bf16 %v172_v35, %v165_v33  ;;  %v173_v40 = vsub.f32 %v171_v30, %v172_v35  ;;  %v186_v45 = vand.u32 4294901760, %v185_v41  ;;  %v180_v46 = vsub.f32 %v178_v38, %v179_v43  ;;  %p971_p12 = pnand %p970_p11, %p964_p8 }
  0x1e   :  { %883 = vmatpush3.bf16.msra.mxu0 %v1033_v14  ;;  %v153_v31 = vand.u32 4294901760, %v152_v27  ;;  %v167_v42 = vand.u32 4294901760, %v166_v37  ;;  %v193_v53 = vand.u32 4294901760, %v192_v47  ;;  %v200_v54 = vand.u32 4294901760, %v199_v48 }
  0x1f   :  { %835 = vmatpush3.bf16.msra.mxu1 %v1033_v14  ;;  %885 = vmatprep.subr.bf16.mxu0 %v1041_v23  ;;  %v174_v44 = vand.u32 4294901760, %v173_v40  ;;  %v900_v50 = vpack.c.bf16 %v186_v45, %v179_v43  ;;  %v187_v51 = vsub.f32 %v185_v41, %v186_v45  ;;  %v181_v52 = vand.u32 4294901760, %v180_v46 }
  0x20   :  { %837 = vmatprep.subr.bf16.mxu1 %v1041_v23  ;;  %v1055_v36 = vpack.c.bf16 %v160_v32, %v153_v31  ;;  %v904_v56 = vpack.c.bf16 %v200_v54, %v193_v53  ;;  %v194_v57 = vsub.f32 %v192_v47, %v193_v53  ;;  %v201_v58 = vsub.f32 %v199_v48, %v200_v54 }
  0x21   :  { %v848_v49 = vpack.c.bf16 %v174_v44, %v167_v42  ;;  %v188_v55 = vand.u32 4294901760, %v187_v51  ;;  %v860_v63 = vpack.c.bf16 %v157_v22, %v150_v21  ;;  %v864_v0 = vpack.c.bf16 %v171_v30, %v164_v29 }
  0x22   :  { %887 = vmatpush3.bf16.msra.mxu0 %v1041_v23  ;;  %v195_v60 = vand.u32 4294901760, %v194_v57  ;;  %v202_v61 = vand.u32 4294901760, %v201_v58  ;;  %v868_v1 = vpack.c.bf16 %v185_v41, %v178_v38  ;;  %v872_v2 = vpack.c.bf16 %v199_v48, %v192_v47 }
  0x23   :  { %839 = vmatpush3.bf16.msra.mxu1 %v1041_v23  ;;  %889 = vmatprep.subr.bf16.mxu0 %v1045_v26  ;;  %v852_v59 = vpack.c.bf16 %v188_v55, %v181_v52  ;;  %v993_v6 = vmov 0.0  }
  0x24   :  { %841 = vmatprep.subr.bf16.mxu1 %v1045_v26  ;;  %v856_v62 = vpack.c.bf16 %v202_v61, %v195_v60 }
  0x26   :  { %891 = vmatpush3.bf16.msra.mxu0 %v1045_v26 }
  0x27   :  { %843 = vmatpush3.bf16.msra.mxu1 %v1045_v26  ;;  %893 = vmatprep.subr.bf16.mxu0 %v1051_v34 }
  0x28   :  { %845 = vmatprep.subr.bf16.mxu1 %v1055_v36 }
  0x94   :  { %v32_v5 = vpop.permute.xlu0 %31 }
  0x95   :  { %vm36_vm1 = vcmp.eq.s32.totalorder %v32_v5, %v29_v4 }
  0x96   :  { %v38_v7 = vsel %vm36_vm1, 11.313708, %v993_v6 }
  0x97   :  { %v50_v8 = vsel %vm48_vm0, %v38_v7, 0 }
  0x98   :  { %v128_v9 = vand.u32 4294901760, %v50_v8  ;;  %v35_v10 = vpop.permute.xlu0 %34 }
  0x99   :  { %vm37_vm2 = vcmp.eq.s32.totalorder %v35_v10, %v29_v4 }
  0x9a   :  { %v129_v11 = vsub.f32 %v50_v8, %v128_v9  ;;  %v39_v12 = vsel %vm37_vm2, 11.313708, %v993_v6 }
  0x9b   :  { %v53_v15 = vsel %vm48_vm0, %v39_v12, 0 }
  0x9c   :  { %v138_v16 = vand.u32 4294901760, %v53_v15  ;;  %v130_v17 = vand.u32 4294901760, %v129_v11 }
  0x9e   :  { %v139_v18 = vsub.f32 %v53_v15, %v138_v16  ;;  %787 = vmatprep.mubr.f32.mxu0 %v130_v17  ;;  %v131_v19 = vsub.f32 %v129_v11, %v130_v17 }
  0xa0   :  { %v132_v20 = vand.u32 4294901760, %v131_v19  ;;  %v140_v21 = vand.u32 4294901760, %v139_v18 }
  0xa2   :  { %730 = vmatprep.mubr.f32.mxu1 %v132_v20  ;;  %788 = vmatmul.mubr.f32.vlgmr.msra.gmra.mrb[0].mxu0 %v140_v21  ;;  %v141_v22 = vsub.f32 %v139_v18, %v140_v21 }
  0xa3   :  { %895 = vmatpush3.bf16.msra.mxu0 %v1051_v34  ;;  %806 = vmatprep.mubr.f32.mxu0 %v128_v9 }
  0xa4   :  { %897 = vmatprep.subr.bf16.mxu0 %v896_v39  ;;  %v142_v24 = vand.u32 4294901760, %v141_v22 }
  0xa6   :  { %731 = vmatmul.mubr.f32.vlgmr.msra.gmra.mrb[0].mxu1 %v142_v24 }
  0xa7   :  { %847 = vmatpush3.bf16.msra.mxu1 %v1055_v36  ;;  %899 = vmatpush3.bf16.msra.mxu0 %v896_v39 }
  0xa8   :  { %749 = vmatprep.mubr.f32.mxu1 %v128_v9  ;;  %849 = vmatprep.subr.bf16.mxu1 %v848_v49 }
  0xa9   :  { %901 = vmatprep.subr.bf16.mxu0 %v900_v50 }
  0xab   :  { %851 = vmatpush3.bf16.msra.mxu1 %v848_v49  ;;  %903 = vmatpush3.bf16.msra.mxu0 %v900_v50 }
  0xac   :  { %853 = vmatprep.subr.bf16.mxu1 %v852_v59  ;;  %905 = vmatprep.subr.bf16.mxu0 %v904_v56 }
  0xaf   :  { %855 = vmatpush3.bf16.msra.mxu1 %v852_v59  ;;  %907 = vmatpush3.bf16.msra.mxu0 %v904_v56 }
  0xb0   :  { %857 = vmatprep.subr.bf16.mxu1 %v856_v62  ;;  %909 = vmatprep.subr.bf16.mxu0 %v1031_v13 }
  0xb2   :  { %807 = vmatmul.mubr.f32.vlgmr.msra.gmra.mrb[0].mxu0 %v138_v16 }
  0xb3   :  { %859 = vmatpush3.bf16.msra.mxu1 %v856_v62  ;;  %911 = vmatpush3.bf16.msra.mxu0 %v1031_v13 }
  0xb4   :  { %825 = vmatprep.mubr.f32.mxu0 %v128_v9  ;;  %861 = vmatprep.subr.bf16.mxu1 %v860_v63 }
  0xb5   :  { %913 = vmatprep.subr.bf16.mxu0 %v1033_v14 }
  0xb6   :  { %750 = vmatmul.mubr.f32.vlgmr.msra.gmra.mrb[0].mxu1 %v138_v16 }
  0xb7   :  { %863 = vmatpush3.bf16.msra.mxu1 %v860_v63  ;;  %768 = vmatprep.mubr.f32.mxu1 %v129_v11 }
  0xb8   :  { %915 = vmatpush3.bf16.msra.mxu0 %v1033_v14  ;;  %865 = vmatprep.subr.bf16.mxu1 %v864_v0 }
  0xb9   :  { %917 = vmatprep.subr.bf16.mxu0 %v1041_v23 }
  0xbb   :  { %867 = vmatpush3.bf16.msra.mxu1 %v864_v0 }
  0xbc   :  { %919 = vmatpush3.bf16.msra.mxu0 %v1041_v23  ;;  %869 = vmatprep.subr.bf16.mxu1 %v868_v1 }
  0xbd   :  { %921 = vmatprep.subr.bf16.mxu0 %v1045_v26 }
  0xbf   :  { %871 = vmatpush3.bf16.msra.mxu1 %v868_v1 }
  0xc0   :  { %923 = vmatpush3.bf16.msra.mxu0 %v1045_v26  ;;  %873 = vmatprep.subr.bf16.mxu1 %v872_v2 }
  0xc3   :  { %826 = vmatmul.mubr.f32.vlgmr.msra.gmra.mrb[0].mxu0 %v138_v16  ;;  %875 = vmatpush3.bf16.msra.mxu1 %v872_v2 }
  0xc6   :  { %769 = vmatmul.mubr.f32.vlgmr.msra.gmra.mrb[0].mxu1 %v139_v18 }
 0x196   :  { %v827_v13 = vpop.f32.mrb[0].mxu0 }
 0x197   :  { %v625_v25 = vpop.f32.mrb[1].mxu0 }
 0x199   :  { %v770_v14 = vpop.f32.mrb[0].mxu1 }
 0x19a   :  { %v924_v27 = vadd.f32 %v827_v13, %v770_v14  ;;  %v349_v28 = vpop.f32.mrb[1].mxu1 }
 0x19b   :  { %v925_v29 = vadd.f32 %v625_v25, %v349_v28 }
 0x19c   :  { %636 = vst [vmem:[#allocation5 + $0x8] sm:$0xff] %v924_v27 }
 0x19d   :  { %635 = vst [vmem:[#allocation5] sm:$0xff] %v925_v29 }
 0x19e   :  { %974 = shalt.err (!%p971_p12)
}
 0x19f   :  { %s975_s30 = scalar_lea.hbm %s1088_s2, 256 }
 0x1a0   :  { %p976_p13 = scmp.ne.s32.totalorder %s1088_s2, %s975_s30  ;;  %p979_p0 = scmp.lt.u32.totalorder %s975_s30, %s1088_s2 }
 0x1a2   :  { %p981_p1 = pnand %p979_p0, %p976_p13 }
 0x1a4   :  { %984 = shalt.err (!%p981_p1)
}
 0x1a5   :  { %648 = dma.vmem_to_hbm [thread:$0]  %s643_s1, 256, %s1088_s2, [#allocation4], %s990_s19, %s990_s19, %s991_s20  }
 0x1a6   :  { %987 = dma.done.wait [#allocation4], 256  }
 0x1a7   :  { %988 = vsyncadd [#allocation4], 4294967040 }
 0x1a8   :  { %652 = vsyncpa [#allocation3], 1 }
 0x1a9   :  { %653 = vsyncpa [#allocation4], 1 }

</bundles_post_ra>
